<compile_context>
chip_gen: v7x
topology: tpu7x:2x2x1
jax: 0.10.0
libtpu: 0.0.40
codegen_flags: <defaults>
</compile_context>

<pallas_src>
import jax
import jax.numpy as jnp
from jax.experimental import pallas as pl
from jax.experimental.pallas import tpu as pltpu


def _round_up(x, m):
    return ((x + m - 1) // m) * m


def critic_kernel(x_ref, w1_ref, b1_ref, w2_ref, b2_ref, o_ref):
    # Hidden layer: x @ W1 on the MXU with f32 accumulation, bias + ReLU on
    # the VPU in f32.
    h = jnp.dot(x_ref[...], w1_ref[...], preferred_element_type=jnp.float32)
    h = jnp.maximum(h + b1_ref[...], 0.0)          # b1 is (1, H), broadcasts

    # Value head (out_features == 1): keep it OFF the MXU — a single-column
    # matmul wastes the array and pays the result-FIFO pop latency for one
    # column.  VPU multiply + lane reduction instead; w2 is a (1, H) row.
    v = jnp.sum(h * w2_ref[...], axis=-1, keepdims=True)

    # b2 is a single f32 scalar held in SMEM.
    o_ref[...] = (v + b2_ref[0]).astype(o_ref.dtype)


def critic_forward(x, w1, b1, w2, b2, *, block_b=4096):
    """Forward pass of the critic MLP.

    x:  (B, S)  f32 or bf16
    w1: (S, H)        b1: (H,)
    w2: (H, 1)        b2: (1,)
    returns (B, 1) f32
    """
    B, S = x.shape
    H = w1.shape[1]
    O = w2.shape[1]  # == 1 for the critic value head

    # Cast the (tiny) first-layer weight to the activation dtype: a bf16
    # producer then uses the bf16 MXU path and halves HBM bytes on x.
    w1_c = w1.astype(x.dtype)
    b1_2d = b1.reshape(1, H).astype(jnp.float32)
    w2_row = w2.reshape(1, H).astype(jnp.float32)   # (H,1) -> (1,H) row vector
    b2_1d = b2.reshape(1).astype(jnp.float32)

    # Batch tile: multiple of 8 sublanes (f32), as big as block_b allows, but
    # keep at least `min_steps` grid steps so both v7x TensorCores get work
    # and each still has >= 2 steps to double-buffer (neutral on v5e/v6e).
    min_steps = 4
    if B <= 8:
        tile_b = B                                  # single block == full dim
    else:
        tile_b = min(block_b, _round_up(pl.cdiv(B, min_steps), 8))
        tile_b = max(8, (tile_b // 8) * 8)
    num_blocks = pl.cdiv(B, tile_b)

    grid_spec = pl.GridSpec(
        grid=(num_blocks,),
        in_specs=[
            # x: tiled along the batch axis (ragged last block handled by
            # Pallas; no wrapper-side padding).
            pl.BlockSpec((tile_b, S), lambda i: (i, 0)),
            # Parameters: full-array blocks, VMEM-resident across the grid.
            pl.BlockSpec((S, H), lambda i: (0, 0)),
            pl.BlockSpec((1, H), lambda i: (0, 0)),
            pl.BlockSpec((1, H), lambda i: (0, 0)),
            # b2: scalar in SMEM (no padded VMEM tile for 4 bytes).
            pl.BlockSpec(memory_space=pltpu.MemorySpace.SMEM),
        ],
        out_specs=pl.BlockSpec((tile_b, O), lambda i: (i, 0)),
    )

    itemsize = jnp.dtype(x.dtype).itemsize
    cost = pl.CostEstimate(
        flops=2 * B * S * H + 2 * B * H,
        transcendentals=0,
        bytes_accessed=(B * S * itemsize            # x read
                        + B * O * 4                 # output write
                        + S * H * itemsize          # w1
                        + (2 * H + 1) * 4),         # b1, w2, b2
    )

    out = pl.pallas_call(
        critic_kernel,
        out_shape=jax.ShapeDtypeStruct((B, O), jnp.float32),
        grid_spec=grid_spec,
        compiler_params=pltpu.CompilerParams(
            # Batch rows are independent: safe parallel axis (megacore on v7x).
            dimension_semantics=("parallel",),
        ),
        cost_estimate=cost,
    )(x, w1_c, b1_2d, w2_row, b2_1d)
    return out


def reference_forward(x, w1, b1, w2, b2):
    h = jnp.maximum(x.astype(jnp.float32) @ w1.astype(jnp.float32) + b1, 0.0)
    return h @ w2 + b2


if __name__ == "__main__":
    # Small shapes consistent with the module's forward.
    batch = 50              # not a multiple of the tile -> exercises ragged last block
    n_states_num = 16
    hidden_size = 32
    n_actions_num = 4       # unused by the critic (value head outputs 1)

    key = jax.random.PRNGKey(0)
    k_x, k_w1, k_b1, k_w2, k_b2 = jax.random.split(key, 5)

    # Deterministic parameter init (uniform, roughly PyTorch Linear-style scale)
    lim1 = 1.0 / jnp.sqrt(n_states_num)
    lim2 = 1.0 / jnp.sqrt(hidden_size)
    w1 = jax.random.uniform(k_w1, (n_states_num, hidden_size),
                            minval=-lim1, maxval=lim1, dtype=jnp.float32)
    b1 = jax.random.uniform(k_b1, (hidden_size,),
                            minval=-lim1, maxval=lim1, dtype=jnp.float32)
    w2 = jax.random.uniform(k_w2, (hidden_size, 1),
                            minval=-lim2, maxval=lim2, dtype=jnp.float32)
    b2 = jax.random.uniform(k_b2, (1,),
                            minval=-lim2, maxval=lim2, dtype=jnp.float32)

    x = jax.random.normal(k_x, (batch, n_states_num), dtype=jnp.float32)
    ref = reference_forward(x, w1, b1, w2, b2)

    # f32 path: matches the PyTorch module's numerics tightly.  With batch=50
    # the sizing rule gives tile_b=16 -> a 4-step pipelined grid with a ragged
    # final block (rows 48..49 valid, rest masked on the output write).
    out = critic_forward(x, w1, b1, w2, b2)
    out = jax.block_until_ready(out)
    assert out.shape == (batch, 1)
    assert jnp.allclose(out, ref, atol=1e-5, rtol=1e-5)

    # bf16-producer path: halves HBM bytes on x and uses the bf16 MXU path
    # (f32 accumulation / elementwise kept in-kernel).  Looser tolerance vs.
    # the f32 reference accounts for bf16 input rounding.
    out_bf16 = critic_forward(x.astype(jnp.bfloat16), w1, b1, w2, b2)
    out_bf16 = jax.block_until_ready(out_bf16)
    assert out_bf16.shape == (batch, 1)
    assert jnp.allclose(out_bf16, ref, atol=3e-2, rtol=3e-2)

    print("KERNEL_OK")
</pallas_src>

<mosaic_0001>
module attributes {stable_mosaic.version = 11 : i64} {
  func.func @critic_kernel(%arg0: i32, %arg1: memref<16x16xf32, #tpu.memory_space<vmem>>, %arg2: memref<16x32xf32, #tpu.memory_space<vmem>>, %arg3: memref<1x32xf32, #tpu.memory_space<vmem>>, %arg4: memref<1x32xf32, #tpu.memory_space<vmem>>, %arg5: memref<1xf32, #tpu.memory_space<smem>>, %arg6: memref<16x1xf32, #tpu.memory_space<vmem>>) attributes {dimension_semantics = [#tpu.dimension_semantics<parallel>], iteration_bounds = array<i64: 4>, scalar_prefetch = 0 : i64, scratch_operands = 0 : i64, tpu.core_type = #tpu.core_type<tc>, window_params = [{transform_indices = @transform_0, window_bounds = array<i64: 16, 16>}, {pipeline_mode = #tpu.pipeline_mode<synchronous>, transform_indices = @transform_1, window_bounds = array<i64: 16, 32>}, {pipeline_mode = #tpu.pipeline_mode<synchronous>, transform_indices = @transform_2, window_bounds = array<i64: 1, 32>}, {pipeline_mode = #tpu.pipeline_mode<synchronous>, transform_indices = @transform_3, window_bounds = array<i64: 1, 32>}, {transform_indices = @transform_4, window_bounds = array<i64: 1>}, {transform_indices = @transform_5, window_bounds = array<i64: 16, 1>}]} {
    %c0 = arith.constant 0 : index
    %c0_0 = arith.constant 0 : index
    %0 = vector.load %arg1[%c0, %c0_0] : memref<16x16xf32, #tpu.memory_space<vmem>>, vector<16x16xf32>
    %c0_1 = arith.constant 0 : index
    %c0_2 = arith.constant 0 : index
    %1 = vector.load %arg2[%c0_1, %c0_2] : memref<16x32xf32, #tpu.memory_space<vmem>>, vector<16x32xf32>
    %cst = arith.constant dense<0.000000e+00> : vector<16x32xf32>
    %2 = tpu.matmul %0, %1, %cst {dimension_numbers = #tpu.dot_dimension_numbers<[1], [0], [0], [1], [0, 0, 1, 1], [], []>} : vector<16x16xf32>, vector<16x32xf32>, vector<16x32xf32> -> vector<16x32xf32>
    %c0_3 = arith.constant 0 : index
    %c0_4 = arith.constant 0 : index
    %3 = vector.load %arg3[%c0_3, %c0_4] : memref<1x32xf32, #tpu.memory_space<vmem>>, vector<1x32xf32>
    %4 = vector.broadcast %3 : vector<1x32xf32> to vector<16x32xf32>
    %5 = arith.addf %2, %4 : vector<16x32xf32>
    %cst_5 = arith.constant 0.000000e+00 : f32
    %6 = vector.broadcast %cst_5 : f32 to vector<16x32xf32>
    %7 = arith.maximumf %5, %6 : vector<16x32xf32>
    %c0_6 = arith.constant 0 : index
    %c0_7 = arith.constant 0 : index
    %8 = vector.load %arg4[%c0_6, %c0_7] : memref<1x32xf32, #tpu.memory_space<vmem>>, vector<1x32xf32>
    %9 = vector.broadcast %8 : vector<1x32xf32> to vector<16x32xf32>
    %10 = arith.mulf %7, %9 : vector<16x32xf32>
    %cst_8 = arith.constant dense<0.000000e+00> : vector<16xf32>
    %11 = vector.multi_reduction <add>, %10, %cst_8 [1] : vector<16x32xf32> to vector<16xf32>
    %12 = vector.shape_cast %11 : vector<16xf32> to vector<16x1xf32>
    %c0_9 = arith.constant 0 : index
    %13 = memref.load %arg5[%c0_9] : memref<1xf32, #tpu.memory_space<smem>>
    %14 = vector.broadcast %13 : f32 to vector<16x1xf32>
    %15 = arith.addf %12, %14 : vector<16x1xf32>
    %c0_10 = arith.constant 0 : index
    %c0_11 = arith.constant 0 : index
    %16 = vector.load %arg6[%c0_10, %c0_11] : memref<16x1xf32, #tpu.memory_space<vmem>>, vector<16x1xf32>
    tpu.vector_store %arg6[%c0_10, %c0_11], %15 {strides = array<i32>} : memref<16x1xf32, #tpu.memory_space<vmem>>, vector<16x1xf32>,
    return
  }
  func.func @transform_0(%arg0: i32) -> (i32, i32) {
    %c0_i32 = arith.constant 0 : i32
    %c0_i32_0 = arith.constant 0 : i32
    return %arg0, %c0_i32 : i32, i32
  }
  func.func @transform_1(%arg0: i32) -> (i32, i32) {
    %c0_i32 = arith.constant 0 : i32
    %c0_i32_0 = arith.constant 0 : i32
    %c0_i32_1 = arith.constant 0 : i32
    return %c0_i32, %c0_i32_0 : i32, i32
  }
  func.func @transform_2(%arg0: i32) -> (i32, i32) {
    %c0_i32 = arith.constant 0 : i32
    %c0_i32_0 = arith.constant 0 : i32
    %c0_i32_1 = arith.constant 0 : i32
    return %c0_i32, %c0_i32_0 : i32, i32
  }
  func.func @transform_3(%arg0: i32) -> (i32, i32) {
    %c0_i32 = arith.constant 0 : i32
    %c0_i32_0 = arith.constant 0 : i32
    %c0_i32_1 = arith.constant 0 : i32
    return %c0_i32, %c0_i32_0 : i32, i32
  }
  func.func @transform_4(%arg0: i32) -> i32 {
    %c0_i32 = arith.constant 0 : i32
    %c0_i32_0 = arith.constant 0 : i32
    return %c0_i32 : i32
  }
  func.func @transform_5(%arg0: i32) -> (i32, i32) {
    %c0_i32 = arith.constant 0 : i32
    %c0_i32_0 = arith.constant 0 : i32
    return %arg0, %c0_i32 : i32, i32
  }
}

</mosaic_0001>

<bundles_post_ra>
// kernel: tpu_custom_call.1
= control target key start
LH: loop header
LB: loop body
LE: loop exit
PB: predicated region body
PF: predicated region fallthrough
CT: control target
= control target key end

     0   :  { %s934_s0 = inlined_call_operand.vmem [shape: f32[50,16], index: 0, kind: input, shape index: {}]   ;;  %s935_s1 = inlined_call_operand.vmem [shape: f32[16,32], index: 1, kind: input, shape index: {}]   ;;  %s936_s2 = inlined_call_operand.vmem [shape: f32[1,32], index: 2, kind: input, shape index: {}]   ;;  %s937_s3 = inlined_call_operand.vmem [shape: f32[1,32], index: 3, kind: input, shape index: {}]   ;;  %s938_s4 = inlined_call_operand.<no memory space> [shape: f32[1], index: 4, kind: input, shape index: {}]   ;;  %s939_s5 = inlined_call_operand.vmem [shape: f32[50,1], index: 5, kind: output, shape index: {}]  }
   0x1   :  { %10 = sst [smem:[#allocation2]] %s938_s4 }
   0x2   :  { %s839_s20 = smov 0   ;;  %s841_s21 = smov 0  }
   0x3   :  { %s843_s22 = smov 0  }
   0x4 LB: > { %s852_s4 = sadd.s32 4294967295, %s772_s22   ;;  %s854_s23 = sadd.s32 1, %s772_s22   ;;  %s772_s22 = sphi %s843_s22, %s943_s22   ;;  %s768_s21 = sphi %s841_s21, %s942_s21   ;;  %s764_s20 = sphi %s839_s20, %s941_s20  }
   0x5   : > { %s130_s24 = ssub.s32 %s772_s22, %s854_s23  ;;  %s133_s25 = sadd.s32 1, %s768_s21 }
   0x6   : > { %p131_p0 = scmp.eq.s32.totalorder %s130_s24, 0  ;;  %p143_p1 = scmp.ne.s32.totalorder %s768_s21, %s764_s20 }
   0x7   : > { %p144_p2 = scmp.eq.s32.totalorder %s852_s4, 3  ;;  %p587_p3 = scmp.ge.s32.totalorder %s772_s22, 1 }
   0x8   : > { %s862_s26 = scalar_select %p131_p0, %s768_s21, %s133_s25  }
   0x9   : > { %p864_p4 = por %p144_p2, %p143_p1  ;;  %p197_p5 = scmp.lt.s32.totalorder %s772_s22, 5 }
   0xb   : > { %p198_p6 = pnand %p587_p3, %p197_p5 }
   0xc   : > { %v249_v0 = vld [vmem:[%s935_s1] sm:$0xff] (!%p198_p6)  ;;  %v250_v1 = vld [vmem:[%s935_s1 + $0x8] sm:$0xff] (!%p198_p6)  ;;  %s875_s7 = sshll.u32 (!%p198_p6), %s852_s4, 1  ;;  %vm258_vm0 = vcmask (!%p198_p6), 130048   ;;  %vm351_vm1 = vcmask (!%p198_p6), 261120   ;;  %s358_s17 = sld [smem:[#allocation2]] (!%p198_p6) }
   0xd   : > { %201 = sbr.rel (%p198_p6) target bundleno = 444 (0x1bc), region = 40  ;;  %v626_v2 = vpack.c.bf16 (!%p198_p6), %v250_v1, %v249_v0  ;;  %p233_p7 = scmp.lt.s32.totalorder (!%p198_p6), %s875_s7, 6  ;;  %v591_v5 = vld [vmem:[%s936_s2] ss:$0 sm:$0xff] (!%p198_p6)  ;;  %vm362_vm2 = vcmask (!%p198_p6), 7168  }
   0xe   : > { %v594_v10 = vld [vmem:[%s937_s3] ss:$0 sm:$0xff] (!%p198_p6)  ;;  %s225_s18 = sand.u32 (!%p198_p6), 1, %s764_s20  }
   0xf   : > { %627 = vmatprep.subr.bf16.mxu0 (!%p198_p6), %v626_v2  ;;  %s588_s19 = sshll.u32 (!%p198_p6), %s225_s18, 4 }
  0x10   : > { %629 = vmatpush3.bf16.msra.mxu0 (!%p198_p6), %v626_v2  ;;  %s889_s22 = scalar_lea.vmem (!%p198_p6), [#allocation3], %s588_s19  }
  0x12   : > { %v359_v17 = vstv (!%p198_p6), %s358_s17 }
  0x14   : > { %s234_s8 = scalar_select %p233_p7, %s875_s7, 6 }
  0x15   : > { %s373_s24 = ssub.s32 (%p864_p4), 7, %s875_s7  ;;  %s612_s20 = sshll.u32 (%p864_p4), %s852_s4, 4 }
  0x16   : > { %s590_s9 = sshll.u32 %s234_s8, 3  ;;  %p374_p8 = scmp.lt.s32.totalorder (%p864_p4), %s373_s24, 2 }
  0x17   : > { %s236_s12 = scalar_lea.vmem %s934_s0, %s590_s9  ;;  %s900_s29 = scalar_lea.vmem (%p864_p4), %s939_s5, %s612_s20  }
  0x18   : > { %v247_v3 = vld [vmem:[%s236_s12] sm:$0xff]  ;;  %v248_v4 = vld [vmem:[%s236_s12 + $0x8] sm:$0xff] }
  0x19   : > { %623 = vmatprep.mubr.msk.f32.mxu0 %vm258_vm0, %v247_v3 }
  0x1a   : > { %624 = vmatmul.mubr.msk.f32.vlgmr.msra.gmra.mrb[0].mxu0 %vm258_vm0, %v248_v4 }
  0xed   : > { %v625_v6 = vpop.f32.mrb[0].mxu0 }
  0xee   : > { %v337_v7 = vadd.f32 %v625_v6, %v591_v5  ;;  %v331_v8 = vpop.f32.mrb[1].mxu0 }
  0xef   : > { %v332_v9 = vadd.f32 %v591_v5, %v331_v8 }
  0xf0   : > { %v341_v11 = vmax.f32 %v337_v7, 0.0 }
  0xf1   : > { %v340_v12 = vmax.f32 %v332_v9, 0.0 }
  0xf2   : > { %v350_v15 = vmul.f32 %v594_v10, %v341_v11 }
  0xf3   : > { %v349_v13 = vmul.f32 %v594_v10, %v340_v12 }
  0xf4   : > { %v355_v16 = vsel %vm351_vm1, %v350_v15, 0.0 }
  0xf5   : > { %v352_v14 = vsel %vm351_vm1, %v349_v13, 0.0 }
  0xf6   : > { %353 = vadd.xlane.f32.xlu0 %v352_v14 }
  0xfa   : > { %356 = vadd.xlane.f32.xlu0 %v355_v16 }
 0x183   : > { %v354_v18 = vpop.xlane.xlu0 %353 }
 0x184   : > { %v360_v19 = vadd.f32 %v359_v17, %v354_v18  ;;  %371 = sbr.rel (!%p864_p4) target bundleno = 444 (0x1bc), region = 44 }
 0x186   : > { %363 = vst.msk [vmem:[%s889_s22] sm:$0xff] %vm362_vm2, %v360_v19 }
 0x187   : > { %v357_v20 = vpop.xlane.xlu0 %356 }
 0x188   : > { %v361_v21 = vadd.f32 %v359_v17, %v357_v20 }
 0x18a   : > { %364 = vst.msk [vmem:[%s889_s22 + $0x8] sm:$0xff] %vm362_vm2, %v361_v21 }
 0x18b   : > { %s945_s24 = smov (!%p374_p8, %s373_s24), 2 }
 0x18c   : > { %s597_s30 = sshll.u32 %s945_s24, 7 }
 0x18d   : > { %p600_p9 = scmp.eq.s32.totalorder %s597_s30, 0 }
 0x18e   : > { %s906_s6 = sshrl.u32 (!%p600_p9), %s945_s24, 1 }
 0x18f   : > { %382 = sbr.rel (%p600_p9) target bundleno = 444 (0x1bc), region = 48  ;;  %p601_p10 = scmp.le.s32.totalorder (!%p600_p9), %s906_s6, 0 }
 0x196   : > { %540 = sbr.rel (%p601_p10) target bundleno = 423 (0x1a7), region = 124  ;;  %s774_s4 = smov (!%p601_p10), %s900_s29  }
 0x197   : > { %s778_s27 = smov (!%p601_p10), %s889_s22   ;;  %s782_s7 = smov (!%p601_p10), 0  }
 0x198   : > { %s786_s8 = smov (!%p601_p10), 0  }
 0x19d LB: >> { %v446_v22 = vld [vmem:[%s780_s27] sm:$0xff]  ;;  %v448_v23 = vld [vmem:[%s780_s27 + $0x8] sm:$0xff]  ;;  %s450_s9 = sadd.s32 1, %s784_s7  ;;  %s440_s8 = sadd.s32 1, %s788_s8   ;;  %s788_s8 = sphi %s786_s8, %s440_s8   ;;  %s784_s7 = sphi %s782_s7, %s783_s7   ;;  %s780_s27 = sphi %s778_s27, %s455_s27   ;;  %s776_s4 = sphi %s774_s4, %s456_s4  }
 0x19e   : >> { %447 = vst [vmem:[%s776_s4] sm:$0xff] %v446_v22  ;;  %449 = vst [vmem:[%s776_s4 + $0x8] sm:$0xff] %v448_v23  ;;  %p451_p11 = scmp.ge.s32.totalorder %s450_s9, %s906_s6  ;;  %p439_p12 = scmp.ge.s32.totalorder %s440_s8, %s906_s6 }
 0x1a0   : >> { %s947_s9 = smov (%p451_p11, %s450_s9), 0  ;;  %442 = sbr.rel (!%p439_p12) target bundleno = 413 (0x19d), region = 130 }
 0x1a1   : >> { %s602_s10 = sshll.u32 %s947_s9, 4  ;;  %s783_s7 = smov %s947_s9  }
 0x1a2   : >> { %s455_s27 = scalar_lea.vmem %s889_s22, %s602_s10 [#allocation3]   ;;  %s456_s4 = scalar_lea.vmem %s900_s29, %s602_s10  }
 0x1a7 PF: > { %s916_s11 = sand.u32 1, %s945_s24   ;;  %s613_s12 = sshll.u32 %s906_s6, 4 }
 0x1a8   : > { %s461_s13 = scalar_lea.vmem %s889_s22, %s613_s12 [#allocation3]   ;;  %s463_s14 = scalar_lea.vmem %s900_s29, %s613_s12  }
 0x1a9   : > { %p607_p13 = scmp.le.s32.totalorder %s916_s11, 0 }
 0x1aa   : > { %s790_s15 = smov (!%p607_p13), %s463_s14   ;;  %s794_s16 = smov (!%p607_p13), %s461_s13  }
 0x1ab   : > { %554 = sbr.rel (%p607_p13) target bundleno = 444 (0x1bc), region = 135  ;;  %s798_s17 = smov (!%p607_p13), 0  }
 0x1ac   : > { %s802_s18 = smov (!%p607_p13), 0  }
 0x1b2 LB: >> { %v473_v24 = vld [vmem:[%s796_s16] sm:$0xff]  ;;  %s475_s19 = sadd.s32 1, %s800_s17  ;;  %s467_s18 = sadd.s32 1, %s804_s18   ;;  %s804_s18 = sphi %s802_s18, %s467_s18   ;;  %s800_s17 = sphi %s798_s17, %s799_s17   ;;  %s796_s16 = sphi %s794_s16, %s480_s16   ;;  %s792_s15 = sphi %s790_s15, %s481_s15  }
 0x1b3   : >> { %474 = vst [vmem:[%s792_s15] sm:$0xff] %v473_v24  ;;  %p476_p0 = scmp.ge.s32.totalorder %s475_s19, %s916_s11  ;;  %p466_p1 = scmp.ge.s32.totalorder %s467_s18, %s916_s11 }
 0x1b5   : >> { %s949_s19 = smov (%p476_p0, %s475_s19), 0  ;;  %469 = sbr.rel (!%p466_p1) target bundleno = 434 (0x1b2), region = 141 }
 0x1b6   : >> { %s608_s22 = sshll.u32 %s949_s19, 3  ;;  %s799_s17 = smov %s949_s19  }
 0x1b7   : >> { %s480_s16 = scalar_lea.vmem %s461_s13, %s608_s22 [#allocation3]   ;;  %s481_s15 = scalar_lea.vmem %s463_s14, %s608_s22  }
 0x1bc PF: > { %p13_p2 = scmp.ge.s32.totalorder %s854_s23, 6   ;;  %s941_s20 = smov %s768_s21 }
 0x1bd   : > { %s942_s21 = smov %s862_s26  ;;  %s943_s22 = smov %s854_s23 }
 0x1be   :  { %15 = sbr.rel (!%p13_p2) target bundleno = 4 (0x4), region = 152 }

</bundles_post_ra>
